<compile_context>
chip_gen: v7x
topology: tpu7x:2x2x1
jax: 0.10.0
libtpu: 0.0.40
codegen_flags: <defaults>
</compile_context>

<pallas_src>
import functools

import jax
import jax.numpy as jnp
from jax import lax
from jax.experimental import pallas as pl
from jax.experimental.pallas import tpu as pltpu


_ACTIVATIONS = {
    "relu": lambda h: jnp.maximum(h, 0.0),
    "sigmoid": jax.nn.sigmoid,
    "tanh": jnp.tanh,
    "elu": jax.nn.elu,
    "selu": jax.nn.selu,
    "leakyrelu": lambda h: jax.nn.leaky_relu(h, 0.01),
    "softplus": jax.nn.softplus,
    "none": lambda h: h,
}
_TRANSCENDENTAL_ACTS = {"sigmoid", "tanh", "elu", "selu", "softplus"}
# TODO(synk): GLU (halves the feature dim) is not supported in the fused kernel.


def _round_up(v, m):
    return ((v + m - 1) // m) * m


def _fc_kernel(x_ref, w_ref, b_ref, o_ref, acc_ref, *, activation):
    """One (bm, bn) output tile; reduces over the K grid axis (last, 'arbitrary')."""
    @pl.when(pl.program_id(2) == 0)
    def _():
        acc_ref[...] = jnp.zeros_like(acc_ref)

    # x tile: (bm, bk) bf16, W tile: (bn, bk) bf16 in native nn.Linear layout.
    # Contract over K (last dim of both); accumulate in f32 on the MXU.
    acc_ref[...] += lax.dot_general(
        x_ref[...], w_ref[...],
        dimension_numbers=(((1,), (1,)), ((), ())),
        preferred_element_type=jnp.float32,
    )

    @pl.when(pl.program_id(2) == pl.num_programs(2) - 1)
    def _():
        h = acc_ref[...] + b_ref[...]            # (bm, bn) + (1, bn) broadcast
        h = _ACTIVATIONS[activation](h)
        o_ref[...] = h.astype(o_ref.dtype)       # single lane-dense store


def fc_layer(x, weight, bias=None, *, activation="relu",
             tm=512, tn=512, tk=1024, compute_dtype=jnp.bfloat16):
    """FCLayer forward: activation(x @ weight.T + bias).

    x:      (M, in_size)
    weight: (out_size, in_size)   -- PyTorch nn.Linear layout (not transposed)
    bias:   (out_size,) or None
    """
    M, K = x.shape
    N, K2 = weight.shape
    assert K == K2, "weight/in_size mismatch"
    activation = (activation or "none").lower()
    assert activation in _ACTIVATIONS, f"unsupported activation: {activation}"

    compute_dtype = jnp.dtype(compute_dtype)
    out_dtype = x.dtype
    # Sublane packing is dtype dependent: 8 rows (f32), 16 (bf16), 32 (int8/fp8).
    sub = {4: 8, 2: 16, 1: 32}[compute_dtype.itemsize]
    lane = 128

    bm = min(tm, _round_up(M, sub))
    bn = min(tn, _round_up(N, lane))
    bk = min(tk, _round_up(K, lane))
    Mp, Np, Kp = _round_up(M, bm), _round_up(N, bn), _round_up(K, bk)

    # v7x has 2 TensorCores: if both parallel axes collapse to a single block,
    # halve bn (keeping lane alignment) so the second core gets work.
    if Mp // bm == 1 and Np // bn == 1 and bn > lane:
        bn = max(lane, _round_up(bn // 2, lane))
        Np = _round_up(N, bn)

    # Cast to bf16 MXU operands in the wrapper (halves x/W HBM traffic too).
    xq = x.astype(compute_dtype)
    wq = weight.astype(compute_dtype)
    # Zero-pad only when not already tile-aligned (exact for matmul + bias).
    if (Mp, Kp) != (M, K):
        xq = jnp.pad(xq, ((0, Mp - M), (0, Kp - K)))
    if (Np, Kp) != (N, K):
        wq = jnp.pad(wq, ((0, Np - N), (0, Kp - K)))
    b = jnp.zeros((N,), jnp.float32) if bias is None else bias.astype(jnp.float32)
    bp = (jnp.pad(b, (0, Np - N)) if Np != N else b).reshape(1, Np)

    grid = (Mp // bm, Np // bn, Kp // bk)

    # Advisory cost: count per-tile re-reads (x once per N tile, W once per M
    # tile) and EUP transcendentals for exp-based activations.
    bytes_accessed = (
        Mp * Kp * compute_dtype.itemsize * (Np // bn)
        + Np * Kp * compute_dtype.itemsize * (Mp // bm)
        + Np * 4
        + Mp * Np * jnp.dtype(out_dtype).itemsize
    )
    cost = pl.CostEstimate(
        flops=2 * Mp * Kp * Np,
        transcendentals=Mp * Np if activation in _TRANSCENDENTAL_ACTS else 0,
        bytes_accessed=bytes_accessed,
    )

    out = pl.pallas_call(
        functools.partial(_fc_kernel, activation=activation),
        out_shape=jax.ShapeDtypeStruct((Mp, Np), out_dtype),
        grid_spec=pltpu.PrefetchScalarGridSpec(
            num_scalar_prefetch=0,
            grid=grid,
            in_specs=[
                pl.BlockSpec((bm, bk), lambda i, j, k: (i, k)),   # x tile (bf16)
                pl.BlockSpec((bn, bk), lambda i, j, k: (j, k)),   # W tile, native (N, K)
                pl.BlockSpec((1, bn), lambda i, j, k: (0, j)),    # bias tile (f32)
            ],
            out_specs=pl.BlockSpec((bm, bn), lambda i, j, k: (i, j)),
            scratch_shapes=[pltpu.VMEM((bm, bn), jnp.float32)],
        ),
        compiler_params=pltpu.CompilerParams(
            dimension_semantics=("parallel", "parallel", "arbitrary"),
        ),
        cost_estimate=cost,
    )(xq, wq, bp)

    # TODO(synk): Dropout (default p=0.0 -> identity at inference) and BatchNorm1d
    # (default b_norm=False) are not fused into the kernel.
    if (Mp, Np) != (M, N):
        out = out[:M, :N]
    return out


if __name__ == "__main__":
    key = jax.random.PRNGKey(0)
    k1, k2, k3 = jax.random.split(key, 3)

    # Small shapes consistent with FCLayer: (batch, in_size) -> (batch, out_size).
    batch, in_size, out_size = 16, 256, 64

    x = jax.random.normal(k1, (batch, in_size), dtype=jnp.float32)
    # Xavier-uniform-style weight (matches FCLayer.reset_parameters intent).
    limit = (6.0 / (in_size + out_size)) ** 0.5
    w = jax.random.uniform(k2, (out_size, in_size), jnp.float32, -limit, limit)
    b = 0.1 * jax.random.normal(k3, (out_size,), dtype=jnp.float32)

    out = fc_layer(x, w, b, activation="relu")
    out = jax.block_until_ready(out)

    # Reference with the same bf16-operand / f32-accumulate numerics.
    ref = jnp.maximum(
        jnp.dot(x.astype(jnp.bfloat16), w.astype(jnp.bfloat16).T,
                preferred_element_type=jnp.float32) + b,
        0.0,
    )
    assert out.shape == (batch, out_size)
    assert jnp.allclose(out, ref, rtol=1e-2, atol=1e-2), "FCLayer Pallas mismatch"

    print("KERNEL_OK")
</pallas_src>

<mosaic_0001>
module attributes {stable_mosaic.version = 11 : i64} {
  func.func @_fc_kernel(%arg0: i32, %arg1: i32, %arg2: i32, %arg3: memref<16x256xbf16, #tpu.memory_space<vmem>>, %arg4: memref<128x256xbf16, #tpu.memory_space<vmem>>, %arg5: memref<1x128xf32, #tpu.memory_space<vmem>>, %arg6: memref<16x128xf32, #tpu.memory_space<vmem>>, %arg7: memref<16x128xf32, #tpu.memory_space<vmem>>) attributes {dimension_semantics = [#tpu.dimension_semantics<parallel>, #tpu.dimension_semantics<parallel>, #tpu.dimension_semantics<arbitrary>], iteration_bounds = array<i64: 1, 1, 1>, scalar_prefetch = 0 : i64, scratch_operands = 1 : i64, tpu.core_type = #tpu.core_type<tc>, window_params = [{transform_indices = @transform_0, window_bounds = array<i64: 16, 256>}, {transform_indices = @transform_1, window_bounds = array<i64: 128, 256>}, {transform_indices = @transform_2, window_bounds = array<i64: 1, 128>}, {transform_indices = @transform_3, window_bounds = array<i64: 16, 128>}]} {
    %c0_i32 = arith.constant 0 : i32
    %0 = arith.cmpi eq, %arg2, %c0_i32 : i32
    %1 = arith.extui %0 : i1 to i32
    %c0_i32_0 = arith.constant 0 : i32
    %2 = arith.cmpi ne, %1, %c0_i32_0 : i32
    scf.if %2 {
      %cst_10 = arith.constant 0.000000e+00 : f32
      %12 = vector.broadcast %cst_10 : f32 to vector<16x128xf32>
      %c0_11 = arith.constant 0 : index
      %c0_12 = arith.constant 0 : index
      %13 = vector.load %arg7[%c0_11, %c0_12] : memref<16x128xf32, #tpu.memory_space<vmem>>, vector<16x128xf32>
      tpu.vector_store %arg7[%c0_11, %c0_12], %12 {strides = array<i32>} : memref<16x128xf32, #tpu.memory_space<vmem>>, vector<16x128xf32>,
    } else {
    }
    %c0 = arith.constant 0 : index
    %c0_1 = arith.constant 0 : index
    %3 = vector.load %arg7[%c0, %c0_1] : memref<16x128xf32, #tpu.memory_space<vmem>>, vector<16x128xf32>
    %c0_2 = arith.constant 0 : index
    %c0_3 = arith.constant 0 : index
    %4 = vector.load %arg3[%c0_2, %c0_3] : memref<16x256xbf16, #tpu.memory_space<vmem>>, vector<16x256xbf16>
    %c0_4 = arith.constant 0 : index
    %c0_5 = arith.constant 0 : index
    %5 = vector.load %arg4[%c0_4, %c0_5] : memref<128x256xbf16, #tpu.memory_space<vmem>>, vector<128x256xbf16>
    %cst = arith.constant dense<0.000000e+00> : vector<16x128xf32>
    %6 = tpu.matmul %4, %5, %cst {dimension_numbers = #tpu.dot_dimension_numbers<[1], [1], [0], [0], [0, 0, 1, 0], [], []>} : vector<16x256xbf16>, vector<128x256xbf16>, vector<16x128xf32> -> vector<16x128xf32>
    %7 = arith.addf %3, %6 : vector<16x128xf32>
    %c0_6 = arith.constant 0 : index
    %c0_7 = arith.constant 0 : index
    %8 = vector.load %arg7[%c0_6, %c0_7] : memref<16x128xf32, #tpu.memory_space<vmem>>, vector<16x128xf32>
    tpu.vector_store %arg7[%c0_6, %c0_7], %7 {strides = array<i32>} : memref<16x128xf32, #tpu.memory_space<vmem>>, vector<16x128xf32>,
    %c0_i32_8 = arith.constant 0 : i32
    %9 = arith.cmpi eq, %arg2, %c0_i32_8 : i32
    %10 = arith.extui %9 : i1 to i32
    %c0_i32_9 = arith.constant 0 : i32
    %11 = arith.cmpi ne, %10, %c0_i32_9 : i32
    scf.if %11 {
      %c0_10 = arith.constant 0 : index
      %c0_11 = arith.constant 0 : index
      %12 = vector.load %arg7[%c0_10, %c0_11] : memref<16x128xf32, #tpu.memory_space<vmem>>, vector<16x128xf32>
      %c0_12 = arith.constant 0 : index
      %c0_13 = arith.constant 0 : index
      %13 = vector.load %arg5[%c0_12, %c0_13] : memref<1x128xf32, #tpu.memory_space<vmem>>, vector<1x128xf32>
      %14 = vector.broadcast %13 : vector<1x128xf32> to vector<16x128xf32>
      %15 = arith.addf %12, %14 : vector<16x128xf32>
      %cst_14 = arith.constant 0.000000e+00 : f32
      %16 = vector.broadcast %cst_14 : f32 to vector<16x128xf32>
      %17 = arith.maximumf %15, %16 : vector<16x128xf32>
      %c0_15 = arith.constant 0 : index
      %c0_16 = arith.constant 0 : index
      %18 = vector.load %arg6[%c0_15, %c0_16] : memref<16x128xf32, #tpu.memory_space<vmem>>, vector<16x128xf32>
      tpu.vector_store %arg6[%c0_15, %c0_16], %17 {strides = array<i32>} : memref<16x128xf32, #tpu.memory_space<vmem>>, vector<16x128xf32>,
    } else {
    }
    return
  }
  func.func @transform_0(%arg0: i32, %arg1: i32, %arg2: i32) -> (i32, i32) {
    %c0_i32 = arith.constant 0 : i32
    return %arg0, %arg2 : i32, i32
  }
  func.func @transform_1(%arg0: i32, %arg1: i32, %arg2: i32) -> (i32, i32) {
    %c0_i32 = arith.constant 0 : i32
    return %arg1, %arg2 : i32, i32
  }
  func.func @transform_2(%arg0: i32, %arg1: i32, %arg2: i32) -> (i32, i32) {
    %c0_i32 = arith.constant 0 : i32
    %c0_i32_0 = arith.constant 0 : i32
    return %c0_i32, %arg1 : i32, i32
  }
  func.func @transform_3(%arg0: i32, %arg1: i32, %arg2: i32) -> (i32, i32) {
    %c0_i32 = arith.constant 0 : i32
    return %arg0, %arg1 : i32, i32
  }
}

</mosaic_0001>

<bundles_post_ra>
// kernel: tpu_custom_call.1
= control target key start
LH: loop header
LB: loop body
LE: loop exit
PB: predicated region body
PF: predicated region fallthrough
CT: control target
= control target key end

     0   :  { %8 = vsyncpa [#allocation4], 0  ;;  %s437_s0 = inlined_call_operand.hbm [shape: bf16[16,256], index: 0, kind: input, shape index: {}]   ;;  %s438_s1 = inlined_call_operand.hbm [shape: bf16[128,256], index: 1, kind: input, shape index: {}]   ;;  %s439_s2 = inlined_call_operand.vmem [shape: f32[1,128], index: 2, kind: input, shape index: {}]   ;;  %s440_s3 = inlined_call_operand.hbm [shape: f32[16,128], index: 3, kind: output, shape index: {}]  }
   0x1   :  { %9 = vsyncpa [#allocation7], 0 }
   0x2   :  { %10 = vsyncpa [#allocation5], 0  ;;  %s364_s12 = smov [#allocation3]   ;;  %s292_s16 = scalar_lea.hbm %s437_s0, 256 }
   0x3   :  { %s16_s13 = sshll.u32 %s364_s12, 4  ;;  %p293_p0 = scmp.ne.s32.totalorder %s437_s0, %s292_s16  ;;  %s17_s13 = int_to_ptr.vmem [resolvable:$true] %s16_s13 }
   0x4   :  { %p296_p1 = scmp.lt.u32.totalorder %s292_s16, %s437_s0 }
   0x6   :  { %p298_p2 = pnand %p296_p1, %p293_p0 }
   0x8   :  { %301 = shalt.err (!%p298_p2)
}
   0x9   :  { %s302_s21 = scalar_lea.vmem %s17_s13, 256  ;;  %p307_p4 = scmp.lt.s32.totalorder %s17_s13, %s17_s13 }
   0xa   :  { %p303_p3 = scmp.ne.s32.totalorder %s17_s13, %s302_s21  ;;  %p308_p5 = scmp.lt.s32.totalorder %s302_s21, %s302_s21 }
   0xc   :  { %p309_p6 = por %p308_p5, %p307_p4 }
   0xe   :  { %p310_p7 = pnand %p309_p6, %p303_p3 }
  0x10   :  { %313 = shalt.err (!%p310_p7)
}
  0x11   :  { %s365_s22 = smov 128   ;;  %s366_s23 = smov 8  }
  0x12   :  { %22 = dma.hbm_to_vmem [thread:$0]  %s437_s0, 256, %s17_s13, [#allocation4], %s365_s22, %s365_s22, %s366_s23  }
  0x13   :  { %s367_s26 = smov [#allocation6]   ;;  %s314_s30 = scalar_lea.hbm %s438_s1, 2048 }
  0x14   :  { %s28_s27 = sshll.u32 %s367_s26, 4  ;;  %p315_p8 = scmp.ne.s32.totalorder %s438_s1, %s314_s30  ;;  %s29_s27 = int_to_ptr.vmem [resolvable:$true] %s28_s27 }
  0x15   :  { %p318_p9 = scmp.lt.u32.totalorder %s314_s30, %s438_s1 }
  0x17   :  { %p320_p10 = pnand %p318_p9, %p315_p8 }
  0x19   :  { %323 = shalt.err (!%p320_p10)
}
  0x1a   :  { %s324_s8 = scalar_lea.vmem %s29_s27, 2048  ;;  %p329_p12 = scmp.lt.s32.totalorder %s29_s27, %s29_s27 }
  0x1b   :  { %p325_p11 = scmp.ne.s32.totalorder %s29_s27, %s324_s8  ;;  %p330_p13 = scmp.lt.s32.totalorder %s324_s8, %s324_s8 }
  0x1d   :  { %p331_p0 = por %p330_p13, %p329_p12 }
  0x1f   :  { %p332_p1 = pnand %p331_p0, %p325_p11 }
  0x21   :  { %335 = shalt.err (!%p332_p1)
}
  0x22   :  { %34 = dma.hbm_to_vmem [thread:$0]  %s438_s1, 2048, %s29_s27, [#allocation7], %s365_s22, %s365_s22, %s366_s23  }
  0x23   :  { %358 = dma.done.wait [#allocation4], 256  }
  0x24   :  { %359 = vsyncadd [#allocation4], 4294967040 }
  0x25   :  { %360 = dma.done.wait [#allocation7], 2048  }
  0x26   :  { %361 = vsyncadd [#allocation7], 4294965248  ;;  %v265_v0 = vld [vmem:[#allocation6 + $0x4] ss:$8 sps:$4 sm:$0xff]   ;;  %v267_v1 = vld [vmem:[#allocation6] ss:$8 sps:$4 sm:$0xff]  }
  0x27   :  { %160 = vmatprep.subr.bf16.mxu0 %v265_v0  ;;  %v268_v2 = vld [vmem:[#allocation6 + $0x14] ss:$8 sps:$4 sm:$0xff]   ;;  %v270_v3 = vld [vmem:[#allocation6 + $0x10] ss:$8 sps:$4 sm:$0xff]   ;;  %v271_v4 = vld [vmem:[#allocation6 + $0x24] ss:$8 sps:$4 sm:$0xff]  }
  0x28   :  { %161 = vmatpush1.bf16.xpose.msra.mxu0 %v267_v1  ;;  %v291_v5 = vld [vmem:[#allocation3 + $0x4] ss:$8 sps:$4 sm:$0xff]   ;;  %v273_v6 = vld [vmem:[#allocation6 + $0x20] ss:$8 sps:$4 sm:$0xff]   ;;  %v276_v8 = vld [vmem:[#allocation6 + $0x30] ss:$8 sps:$4 sm:$0xff]  }
  0x29   :  { %162 = vmatprep.subr.bf16.mxu0 %v268_v2  ;;  %192 = vmatprep.mubr.bf16.mxu0 %v291_v5  ;;  %v274_v7 = vld [vmem:[#allocation6 + $0x34] ss:$8 sps:$4 sm:$0xff]   ;;  %v277_v9 = vld [vmem:[#allocation6 + $0x44] ss:$8 sps:$4 sm:$0xff]   ;;  %v279_v10 = vld [vmem:[#allocation6 + $0x40] ss:$8 sps:$4 sm:$0xff]  }
  0x2a   :  { %v280_v11 = vld [vmem:[#allocation6 + $0x54] ss:$8 sps:$4 sm:$0xff]   ;;  %v282_v12 = vld [vmem:[#allocation6 + $0x50] ss:$8 sps:$4 sm:$0xff]   ;;  %v283_v13 = vld [vmem:[#allocation6 + $0x64] ss:$8 sps:$4 sm:$0xff]  }
  0x2b   :  { %v285_v14 = vld [vmem:[#allocation6 + $0x60] ss:$8 sps:$4 sm:$0xff]   ;;  %v286_v15 = vld [vmem:[#allocation6 + $0x74] ss:$8 sps:$4 sm:$0xff]   ;;  %v288_v16 = vld [vmem:[#allocation6 + $0x70] ss:$8 sps:$4 sm:$0xff]  }
  0x2c   :  { %v289_v17 = vld [vmem:[#allocation3] ss:$8 sps:$4 sm:$0xff]   ;;  %s368_s11 = smov [#allocation8]  }
  0x2d   :  { %v259_v18 = vld [vmem:[%s439_s2] ss:$0 sm:$0xff]  ;;  %s228_s12 = sshll.u32 %s368_s11, 4  ;;  %s229_s12 = int_to_ptr.vmem [resolvable:$true] %s228_s12 }
  0x2e   :  { %s336_s13 = scalar_lea.vmem %s229_s12, 256  ;;  %p341_p3 = scmp.lt.s32.totalorder %s229_s12, %s229_s12 }
  0x2f   :  { %p337_p2 = scmp.ne.s32.totalorder %s229_s12, %s336_s13  ;;  %p342_p4 = scmp.lt.s32.totalorder %s336_s13, %s336_s13 }
  0x30   :  { %163 = vmatpush1.bf16.xpose.msra.mxu0 %v270_v3 }
  0x31   :  { %164 = vmatprep.subr.bf16.mxu0 %v271_v4  ;;  %p343_p5 = por %p342_p4, %p341_p3 }
  0x33   :  { %p344_p6 = pnand %p343_p5, %p337_p2 }
  0x38   :  { %165 = vmatpush1.bf16.xpose.msra.mxu0 %v273_v6 }
  0x39   :  { %166 = vmatprep.subr.bf16.mxu0 %v274_v7 }
  0x40   :  { %167 = vmatpush1.bf16.xpose.msra.mxu0 %v276_v8 }
  0x41   :  { %168 = vmatprep.subr.bf16.mxu0 %v277_v9 }
  0x48   :  { %169 = vmatpush1.bf16.xpose.msra.mxu0 %v279_v10 }
  0x49   :  { %170 = vmatprep.subr.bf16.mxu0 %v280_v11 }
  0x50   :  { %171 = vmatpush1.bf16.xpose.msra.mxu0 %v282_v12 }
  0x51   :  { %172 = vmatprep.subr.bf16.mxu0 %v283_v13 }
  0x58   :  { %173 = vmatpush1.bf16.xpose.msra.mxu0 %v285_v14 }
  0x59   :  { %174 = vmatprep.subr.bf16.mxu0 %v286_v15 }
  0x60   :  { %175 = vmatpush1.bf16.xpose.msra.mxu0 %v288_v16 }
  0x67   :  { %193 = vmatmul.mubr.bf16.vlgmr.msra.gmra.mrb[0].mxu0 %v289_v17 }
 0x13a   :  { %v194_v19 = vpop.f32.mrb[0].mxu0 }
 0x13b   :  { %v217_v20 = vadd.f32 %v259_v18, %v194_v19  ;;  %v196_v21 = vpop.f32.mrb[1].mxu0 }
 0x13c   :  { %v197_v22 = vpop.f32.mrb[2].mxu0 }
 0x13d   :  { %v219_v23 = vmax.f32 %v217_v20, 0.0  ;;  %v218_v24 = vadd.f32 %v259_v18, %v197_v22  ;;  %v199_v25 = vpop.f32.mrb[3].mxu0 }
 0x13f   :  { %221 = vst [vmem:[#allocation8] sm:$0xff] %v219_v23  ;;  %v220_v26 = vmax.f32 %v218_v24, 0.0 }
 0x141   :  { %222 = vst [vmem:[#allocation8 + $0x8] sm:$0xff] %v220_v26 }
 0x142   :  { %347 = shalt.err (!%p344_p6)
}
 0x143   :  { %s348_s15 = scalar_lea.hbm %s440_s3, 256 }
 0x144   :  { %p349_p7 = scmp.ne.s32.totalorder %s440_s3, %s348_s15  ;;  %p352_p8 = scmp.lt.u32.totalorder %s348_s15, %s440_s3 }
 0x146   :  { %p354_p9 = pnand %p352_p8, %p349_p7 }
 0x148   :  { %357 = shalt.err (!%p354_p9)
}
 0x149   :  { %234 = dma.vmem_to_hbm [thread:$0]  %s229_s12, 256, %s440_s3, [#allocation5], %s365_s22, %s365_s22, %s366_s23  }
 0x14a   :  { %362 = dma.done.wait [#allocation5], 256  }
 0x14b   :  { %363 = vsyncadd [#allocation5], 4294967040 }
 0x14c   :  { %238 = vsyncpa [#allocation4], 1 }
 0x14d   :  { %239 = vsyncpa [#allocation7], 1 }
 0x14e   :  { %240 = vsyncpa [#allocation5], 1 }

</bundles_post_ra>
